<compile_context>
chip_gen: v7x
topology: tpu7x:2x2x1
jax: 0.10.0
libtpu: 0.0.40
codegen_flags: <defaults>
</compile_context>

<pallas_src>
import functools

import jax
import jax.numpy as jnp
from jax.experimental import pallas as pl
from jax.experimental.pallas import tpu as pltpu

_LANE = 128
_SUBLANE = 8
_VMEM_LIMIT = 32 * 1024 * 1024          # safe scoped-VMEM limit on v5e/v6e/v7x
_INPUT_VMEM_BUDGET = 24 * 1024 * 1024   # 2 inputs x 2 pipeline buffers


def _round_up(a: int, m: int) -> int:
    return (a + m - 1) // m * m


def _cdiv(a: int, m: int) -> int:
    return -(-a // m)


def _make_negpea_kernel(t_true: int, tk: int, rem: int):
    """Build the kernel with the true T, time tile tk, and last-block extent rem."""
    t_f = float(t_true)
    n_chunks_full = tk // _LANE
    n_chunks_last = _cdiv(rem, _LANE)

    def _accumulate(x_ref, y_ref, acc_refs, n_chunks, valid):
        # Accumulate chunk sums in local f32 values (VPU only); a single
        # read-modify-write per scratch accumulator per grid step.
        loc = None
        for c in range(n_chunks):
            lo, hi = c * _LANE, (c + 1) * _LANE
            xs = x_ref[:, lo:hi].astype(jnp.float32)
            ys = y_ref[:, lo:hi].astype(jnp.float32)
            if valid is not None and hi > valid:
                # Partial trailing chunk: zero the lanes past the valid extent
                # (static threshold; at most one chunk per call takes this path).
                lane = jax.lax.broadcasted_iota(jnp.int32, xs.shape, 1)
                m = lane < (valid - lo)
                xs = jnp.where(m, xs, 0.0)
                ys = jnp.where(m, ys, 0.0)
            terms = (xs, ys, xs * ys, xs * xs, ys * ys)
            if loc is None:
                loc = list(terms)
            else:
                loc = [a + b for a, b in zip(loc, terms)]
        for r, a in zip(acc_refs, loc):
            r[...] += a

    def kernel(x_ref, y_ref, o_ref, sx_ref, sy_ref, sxy_ref, sx2_ref, sy2_ref):
        k = pl.program_id(1)
        last = pl.num_programs(1) - 1
        acc_refs = (sx_ref, sy_ref, sxy_ref, sx2_ref, sy2_ref)

        # ---- init accumulators at the first time step ----------------------
        @pl.when(k == 0)
        def _init():
            for r in acc_refs:
                r[...] = jnp.zeros(r.shape, r.dtype)

        # ---- partial accumulation over 128-lane chunks ----------------------
        if rem == tk:
            _accumulate(x_ref, y_ref, acc_refs, n_chunks_full, None)
        else:
            @pl.when(k != last)
            def _full_block():
                _accumulate(x_ref, y_ref, acc_refs, n_chunks_full, None)

            @pl.when(k == last)
            def _ragged_block():
                _accumulate(x_ref, y_ref, acc_refs, n_chunks_last, rem)

        # ---- finalize: one cross-lane reduce + Pearson epilogue -------------
        @pl.when(k == last)
        def _finalize():
            sx = jnp.sum(sx_ref[...], axis=1, keepdims=True)     # (nm, 1)
            sy = jnp.sum(sy_ref[...], axis=1, keepdims=True)
            sxy = jnp.sum(sxy_ref[...], axis=1, keepdims=True)
            sx2 = jnp.sum(sx2_ref[...], axis=1, keepdims=True)
            sy2 = jnp.sum(sy2_ref[...], axis=1, keepdims=True)

            cov = t_f * sxy - sx * sy
            var_x = t_f * sx2 - sx * sx
            var_y = t_f * sy2 - sy * sy
            # rsqrt goes to the EUP (otherwise idle).  Zero-variance rows give
            # NaN, matching torch's divide-by-zero behavior.
            p = cov * jax.lax.rsqrt(var_x * var_y)
            loss = 1.0 - p                                       # (nm, 1)
            o_ref[...] = jnp.broadcast_to(loss, o_ref.shape)     # lane-dense

    return kernel


@functools.partial(jax.jit, static_argnames=("row_block", "time_block"))
def negpea_loss(x, y, *, row_block: int = 64, time_block: int = 8192):
    """Pallas implementation of NegPeaLoss.forward(x, y).

    Accepts 1-D (T,) or 2-D (N, T) inputs of any float dtype (bf16 stays bf16
    in HBM).  Returns a scalar float32.  No padding copies are made for
    misaligned N / T.
    """
    x = jnp.asarray(x)
    y = jnp.asarray(y)
    if x.ndim == 1:
        x = x[None, :]
        y = y[None, :]
    assert x.shape == y.shape and x.ndim == 2
    n, t = x.shape

    # ---- row block (no padding) -------------------------------------------
    if n <= row_block:
        if n >= 2 * _SUBLANE:
            # Split into >= 2 row blocks so the "parallel" axis can shard
            # across the two TensorCores of a v7x chip.
            nm = _round_up(_cdiv(n, 2), _SUBLANE)
        else:
            nm = n                      # full-extent row block (any N is legal)
    else:
        nm = row_block                  # multiple of 8; last block is ragged
    grid_rows = _cdiv(n, nm)

    # ---- time block: multiple of 128, capped by the VMEM input budget ------
    itemsize = int(jnp.dtype(x.dtype).itemsize)
    t_lane = _round_up(t, _LANE)
    tk = min(_round_up(min(time_block, t_lane), _LANE), t_lane)
    max_tk = max(_LANE, (_INPUT_VMEM_BUDGET // (4 * nm * itemsize)) // _LANE * _LANE)
    tk = min(tk, max_tk)
    grid_t = _cdiv(t, tk)
    rem = t - (grid_t - 1) * tk         # valid time extent of the last block

    per_row = pl.pallas_call(
        _make_negpea_kernel(t, tk, rem),
        out_shape=jax.ShapeDtypeStruct((n, _LANE), jnp.float32),
        grid_spec=pltpu.PrefetchScalarGridSpec(
            num_scalar_prefetch=0,
            grid=(grid_rows, grid_t),
            in_specs=[
                pl.BlockSpec((nm, tk), lambda i, k: (i, k)),
                pl.BlockSpec((nm, tk), lambda i, k: (i, k)),
            ],
            out_specs=pl.BlockSpec((nm, _LANE), lambda i, k: (i, 0)),
            scratch_shapes=[pltpu.VMEM((nm, _LANE), jnp.float32) for _ in range(5)],
        ),
        compiler_params=pltpu.CompilerParams(
            dimension_semantics=("parallel", "arbitrary"),
            vmem_limit_bytes=_VMEM_LIMIT,
        ),
    )(x, y)

    # Final mean over rows in plain JAX (output already has exactly n rows).
    return jnp.mean(per_row[:, 0])


def _negpea_loss_ref(x, y):
    # Pure-JAX reference mirroring the torch module.
    x = jnp.asarray(x, jnp.float32)
    y = jnp.asarray(y, jnp.float32)
    if x.ndim == 1:
        x = x[None, :]
        y = y[None, :]
    T = x.shape[1]
    p = T * jnp.sum(x * y, 1) - jnp.sum(x, 1) * jnp.sum(y, 1)
    norm = jnp.sqrt((T * jnp.sum(x ** 2, 1) - jnp.sum(x, 1) ** 2)
                    * (T * jnp.sum(y ** 2, 1) - jnp.sum(y, 1) ** 2))
    return jnp.mean(1.0 - p / norm)


if __name__ == "__main__":
    key = jax.random.PRNGKey(0)
    k1, k2, k3, k4, k5, k6 = jax.random.split(key, 6)

    # Case 1: aligned shapes, single-block path.
    n1, t1 = 4, 384
    x1 = jax.random.normal(k1, (n1, t1), dtype=jnp.float32)
    y1 = 0.5 * x1 + 0.5 * jax.random.normal(k2, (n1, t1), dtype=jnp.float32)
    loss1 = negpea_loss(x1, y1)
    jax.block_until_ready(loss1)
    ref1 = _negpea_loss_ref(x1, y1)
    assert jnp.allclose(loss1, ref1, rtol=1e-4, atol=1e-5), (loss1, ref1)

    # Case 2: ragged rows + ragged time + multi-step time grid (small tiles,
    # exercises lane masking and the ragged last row block, no padding copies).
    n2, t2 = 10, 300
    x2 = jax.random.normal(k3, (n2, t2), dtype=jnp.float32)
    y2 = 0.3 * x2 + 0.7 * jax.random.normal(k4, (n2, t2), dtype=jnp.float32)
    loss2 = negpea_loss(x2, y2, row_block=8, time_block=128)
    jax.block_until_ready(loss2)
    ref2 = _negpea_loss_ref(x2, y2)
    assert jnp.allclose(loss2, ref2, rtol=1e-4, atol=1e-5), (loss2, ref2)

    # Case 3: bf16 inputs, >= 16 rows (two row blocks / v7x split), ragged time.
    n3, t3 = 20, 260
    x3 = jax.random.normal(k5, (n3, t3), dtype=jnp.bfloat16)
    y3 = (0.4 * x3.astype(jnp.float32)
          + 0.6 * jax.random.normal(k6, (n3, t3), dtype=jnp.float32)).astype(jnp.bfloat16)
    loss3 = negpea_loss(x3, y3)
    jax.block_until_ready(loss3)
    ref3 = _negpea_loss_ref(x3, y3)
    assert jnp.allclose(loss3, ref3, rtol=2e-3, atol=2e-3), (loss3, ref3)

    # Case 4: 1-D input path (matches torch's unsqueeze branch).
    loss4 = negpea_loss(x1[0], y1[0])
    jax.block_until_ready(loss4)
    ref4 = _negpea_loss_ref(x1[0], y1[0])
    assert jnp.allclose(loss4, ref4, rtol=1e-4, atol=1e-5), (loss4, ref4)

    print("KERNEL_OK")
</pallas_src>

<mosaic_0001>
module attributes {stable_mosaic.version = 11 : i64} {
  func.func @kernel(%arg0: i32, %arg1: i32, %arg2: memref<4x384xf32, #tpu.memory_space<vmem>>, %arg3: memref<4x384xf32, #tpu.memory_space<vmem>>, %arg4: memref<4x128xf32, #tpu.memory_space<vmem>>, %arg5: memref<4x128xf32, #tpu.memory_space<vmem>>, %arg6: memref<4x128xf32, #tpu.memory_space<vmem>>, %arg7: memref<4x128xf32, #tpu.memory_space<vmem>>, %arg8: memref<4x128xf32, #tpu.memory_space<vmem>>, %arg9: memref<4x128xf32, #tpu.memory_space<vmem>>) attributes {dimension_semantics = [#tpu.dimension_semantics<parallel>, #tpu.dimension_semantics<arbitrary>], iteration_bounds = array<i64: 1, 1>, scalar_prefetch = 0 : i64, scratch_operands = 5 : i64, tpu.core_type = #tpu.core_type<tc>, window_params = [{transform_indices = @transform_0, window_bounds = array<i64: 4, 384>}, {transform_indices = @transform_1, window_bounds = array<i64: 4, 384>}, {transform_indices = @transform_2, window_bounds = array<i64: 4, 128>}]} {
    %c0_i32 = arith.constant 0 : i32
    %0 = arith.cmpi eq, %arg1, %c0_i32 : i32
    %1 = arith.extui %0 : i1 to i32
    %c0_i32_0 = arith.constant 0 : i32
    %2 = arith.cmpi ne, %1, %c0_i32_0 : i32
    scf.if %2 {
      %cst = arith.constant 0.000000e+00 : f32
      %46 = vector.broadcast %cst : f32 to vector<4x128xf32>
      %c0_32 = arith.constant 0 : index
      %c0_33 = arith.constant 0 : index
      %47 = vector.load %arg5[%c0_32, %c0_33] : memref<4x128xf32, #tpu.memory_space<vmem>>, vector<4x128xf32>
      tpu.vector_store %arg5[%c0_32, %c0_33], %46 {strides = array<i32>} : memref<4x128xf32, #tpu.memory_space<vmem>>, vector<4x128xf32>,
      %cst_34 = arith.constant 0.000000e+00 : f32
      %48 = vector.broadcast %cst_34 : f32 to vector<4x128xf32>
      %c0_35 = arith.constant 0 : index
      %c0_36 = arith.constant 0 : index
      %49 = vector.load %arg6[%c0_35, %c0_36] : memref<4x128xf32, #tpu.memory_space<vmem>>, vector<4x128xf32>
      tpu.vector_store %arg6[%c0_35, %c0_36], %48 {strides = array<i32>} : memref<4x128xf32, #tpu.memory_space<vmem>>, vector<4x128xf32>,
      %cst_37 = arith.constant 0.000000e+00 : f32
      %50 = vector.broadcast %cst_37 : f32 to vector<4x128xf32>
      %c0_38 = arith.constant 0 : index
      %c0_39 = arith.constant 0 : index
      %51 = vector.load %arg7[%c0_38, %c0_39] : memref<4x128xf32, #tpu.memory_space<vmem>>, vector<4x128xf32>
      tpu.vector_store %arg7[%c0_38, %c0_39], %50 {strides = array<i32>} : memref<4x128xf32, #tpu.memory_space<vmem>>, vector<4x128xf32>,
      %cst_40 = arith.constant 0.000000e+00 : f32
      %52 = vector.broadcast %cst_40 : f32 to vector<4x128xf32>
      %c0_41 = arith.constant 0 : index
      %c0_42 = arith.constant 0 : index
      %53 = vector.load %arg8[%c0_41, %c0_42] : memref<4x128xf32, #tpu.memory_space<vmem>>, vector<4x128xf32>
      tpu.vector_store %arg8[%c0_41, %c0_42], %52 {strides = array<i32>} : memref<4x128xf32, #tpu.memory_space<vmem>>, vector<4x128xf32>,
      %cst_43 = arith.constant 0.000000e+00 : f32
      %54 = vector.broadcast %cst_43 : f32 to vector<4x128xf32>
      %c0_44 = arith.constant 0 : index
      %c0_45 = arith.constant 0 : index
      %55 = vector.load %arg9[%c0_44, %c0_45] : memref<4x128xf32, #tpu.memory_space<vmem>>, vector<4x128xf32>
      tpu.vector_store %arg9[%c0_44, %c0_45], %54 {strides = array<i32>} : memref<4x128xf32, #tpu.memory_space<vmem>>, vector<4x128xf32>,
    } else {
    }
    %c0 = arith.constant 0 : index
    %c0_1 = arith.constant 0 : index
    %3 = vector.load %arg2[%c0, %c0_1] : memref<4x384xf32, #tpu.memory_space<vmem>>, vector<4x128xf32>
    %c0_2 = arith.constant 0 : index
    %c0_3 = arith.constant 0 : index
    %4 = vector.load %arg3[%c0_2, %c0_3] : memref<4x384xf32, #tpu.memory_space<vmem>>, vector<4x128xf32>
    %5 = arith.mulf %3, %4 : vector<4x128xf32>
    %6 = arith.mulf %3, %3 : vector<4x128xf32>
    %7 = arith.mulf %4, %4 : vector<4x128xf32>
    %c0_4 = arith.constant 0 : index
    %c128 = arith.constant 128 : index
    %8 = vector.load %arg2[%c0_4, %c128] : memref<4x384xf32, #tpu.memory_space<vmem>>, vector<4x128xf32>
    %c0_5 = arith.constant 0 : index
    %c128_6 = arith.constant 128 : index
    %9 = vector.load %arg3[%c0_5, %c128_6] : memref<4x384xf32, #tpu.memory_space<vmem>>, vector<4x128xf32>
    %10 = arith.mulf %8, %9 : vector<4x128xf32>
    %11 = arith.mulf %8, %8 : vector<4x128xf32>
    %12 = arith.mulf %9, %9 : vector<4x128xf32>
    %13 = arith.addf %3, %8 : vector<4x128xf32>
    %14 = arith.addf %4, %9 : vector<4x128xf32>
    %15 = arith.addf %5, %10 : vector<4x128xf32>
    %16 = arith.addf %6, %11 : vector<4x128xf32>
    %17 = arith.addf %7, %12 : vector<4x128xf32>
    %c0_7 = arith.constant 0 : index
    %c256 = arith.constant 256 : index
    %18 = vector.load %arg2[%c0_7, %c256] : memref<4x384xf32, #tpu.memory_space<vmem>>, vector<4x128xf32>
    %c0_8 = arith.constant 0 : index
    %c256_9 = arith.constant 256 : index
    %19 = vector.load %arg3[%c0_8, %c256_9] : memref<4x384xf32, #tpu.memory_space<vmem>>, vector<4x128xf32>
    %20 = arith.mulf %18, %19 : vector<4x128xf32>
    %21 = arith.mulf %18, %18 : vector<4x128xf32>
    %22 = arith.mulf %19, %19 : vector<4x128xf32>
    %23 = arith.addf %13, %18 : vector<4x128xf32>
    %24 = arith.addf %14, %19 : vector<4x128xf32>
    %25 = arith.addf %15, %20 : vector<4x128xf32>
    %26 = arith.addf %16, %21 : vector<4x128xf32>
    %27 = arith.addf %17, %22 : vector<4x128xf32>
    %c0_10 = arith.constant 0 : index
    %c0_11 = arith.constant 0 : index
    %28 = vector.load %arg5[%c0_10, %c0_11] : memref<4x128xf32, #tpu.memory_space<vmem>>, vector<4x128xf32>
    %29 = arith.addf %28, %23 : vector<4x128xf32>
    %c0_12 = arith.constant 0 : index
    %c0_13 = arith.constant 0 : index
    %30 = vector.load %arg5[%c0_12, %c0_13] : memref<4x128xf32, #tpu.memory_space<vmem>>, vector<4x128xf32>
    tpu.vector_store %arg5[%c0_12, %c0_13], %29 {strides = array<i32>} : memref<4x128xf32, #tpu.memory_space<vmem>>, vector<4x128xf32>,
    %c0_14 = arith.constant 0 : index
    %c0_15 = arith.constant 0 : index
    %31 = vector.load %arg6[%c0_14, %c0_15] : memref<4x128xf32, #tpu.memory_space<vmem>>, vector<4x128xf32>
    %32 = arith.addf %31, %24 : vector<4x128xf32>
    %c0_16 = arith.constant 0 : index
    %c0_17 = arith.constant 0 : index
    %33 = vector.load %arg6[%c0_16, %c0_17] : memref<4x128xf32, #tpu.memory_space<vmem>>, vector<4x128xf32>
    tpu.vector_store %arg6[%c0_16, %c0_17], %32 {strides = array<i32>} : memref<4x128xf32, #tpu.memory_space<vmem>>, vector<4x128xf32>,
    %c0_18 = arith.constant 0 : index
    %c0_19 = arith.constant 0 : index
    %34 = vector.load %arg7[%c0_18, %c0_19] : memref<4x128xf32, #tpu.memory_space<vmem>>, vector<4x128xf32>
    %35 = arith.addf %34, %25 : vector<4x128xf32>
    %c0_20 = arith.constant 0 : index
    %c0_21 = arith.constant 0 : index
    %36 = vector.load %arg7[%c0_20, %c0_21] : memref<4x128xf32, #tpu.memory_space<vmem>>, vector<4x128xf32>
    tpu.vector_store %arg7[%c0_20, %c0_21], %35 {strides = array<i32>} : memref<4x128xf32, #tpu.memory_space<vmem>>, vector<4x128xf32>,
    %c0_22 = arith.constant 0 : index
    %c0_23 = arith.constant 0 : index
    %37 = vector.load %arg8[%c0_22, %c0_23] : memref<4x128xf32, #tpu.memory_space<vmem>>, vector<4x128xf32>
    %38 = arith.addf %37, %26 : vector<4x128xf32>
    %c0_24 = arith.constant 0 : index
    %c0_25 = arith.constant 0 : index
    %39 = vector.load %arg8[%c0_24, %c0_25] : memref<4x128xf32, #tpu.memory_space<vmem>>, vector<4x128xf32>
    tpu.vector_store %arg8[%c0_24, %c0_25], %38 {strides = array<i32>} : memref<4x128xf32, #tpu.memory_space<vmem>>, vector<4x128xf32>,
    %c0_26 = arith.constant 0 : index
    %c0_27 = arith.constant 0 : index
    %40 = vector.load %arg9[%c0_26, %c0_27] : memref<4x128xf32, #tpu.memory_space<vmem>>, vector<4x128xf32>
    %41 = arith.addf %40, %27 : vector<4x128xf32>
    %c0_28 = arith.constant 0 : index
    %c0_29 = arith.constant 0 : index
    %42 = vector.load %arg9[%c0_28, %c0_29] : memref<4x128xf32, #tpu.memory_space<vmem>>, vector<4x128xf32>
    tpu.vector_store %arg9[%c0_28, %c0_29], %41 {strides = array<i32>} : memref<4x128xf32, #tpu.memory_space<vmem>>, vector<4x128xf32>,
    %c0_i32_30 = arith.constant 0 : i32
    %43 = arith.cmpi eq, %arg1, %c0_i32_30 : i32
    %44 = arith.extui %43 : i1 to i32
    %c0_i32_31 = arith.constant 0 : i32
    %45 = arith.cmpi ne, %44, %c0_i32_31 : i32
    scf.if %45 {
      %c0_32 = arith.constant 0 : index
      %c0_33 = arith.constant 0 : index
      %46 = vector.load %arg5[%c0_32, %c0_33] : memref<4x128xf32, #tpu.memory_space<vmem>>, vector<4x128xf32>
      %cst = arith.constant dense<0.000000e+00> : vector<4xf32>
      %47 = vector.multi_reduction <add>, %46, %cst [1] : vector<4x128xf32> to vector<4xf32>
      %48 = vector.shape_cast %47 : vector<4xf32> to vector<4x1xf32>
      %c0_34 = arith.constant 0 : index
      %c0_35 = arith.constant 0 : index
      %49 = vector.load %arg6[%c0_34, %c0_35] : memref<4x128xf32, #tpu.memory_space<vmem>>, vector<4x128xf32>
      %cst_36 = arith.constant dense<0.000000e+00> : vector<4xf32>
      %50 = vector.multi_reduction <add>, %49, %cst_36 [1] : vector<4x128xf32> to vector<4xf32>
      %51 = vector.shape_cast %50 : vector<4xf32> to vector<4x1xf32>
      %c0_37 = arith.constant 0 : index
      %c0_38 = arith.constant 0 : index
      %52 = vector.load %arg7[%c0_37, %c0_38] : memref<4x128xf32, #tpu.memory_space<vmem>>, vector<4x128xf32>
      %cst_39 = arith.constant dense<0.000000e+00> : vector<4xf32>
      %53 = vector.multi_reduction <add>, %52, %cst_39 [1] : vector<4x128xf32> to vector<4xf32>
      %54 = vector.shape_cast %53 : vector<4xf32> to vector<4x1xf32>
      %c0_40 = arith.constant 0 : index
      %c0_41 = arith.constant 0 : index
      %55 = vector.load %arg8[%c0_40, %c0_41] : memref<4x128xf32, #tpu.memory_space<vmem>>, vector<4x128xf32>
      %cst_42 = arith.constant dense<0.000000e+00> : vector<4xf32>
      %56 = vector.multi_reduction <add>, %55, %cst_42 [1] : vector<4x128xf32> to vector<4xf32>
      %57 = vector.shape_cast %56 : vector<4xf32> to vector<4x1xf32>
      %c0_43 = arith.constant 0 : index
      %c0_44 = arith.constant 0 : index
      %58 = vector.load %arg9[%c0_43, %c0_44] : memref<4x128xf32, #tpu.memory_space<vmem>>, vector<4x128xf32>
      %cst_45 = arith.constant dense<0.000000e+00> : vector<4xf32>
      %59 = vector.multi_reduction <add>, %58, %cst_45 [1] : vector<4x128xf32> to vector<4xf32>
      %60 = vector.shape_cast %59 : vector<4xf32> to vector<4x1xf32>
      %cst_46 = arith.constant 3.840000e+02 : f32
      %61 = vector.broadcast %cst_46 : f32 to vector<4x1xf32>
      %62 = arith.mulf %61, %54 : vector<4x1xf32>
      %63 = arith.mulf %48, %51 : vector<4x1xf32>
      %64 = arith.subf %62, %63 : vector<4x1xf32>
      %cst_47 = arith.constant 3.840000e+02 : f32
      %65 = vector.broadcast %cst_47 : f32 to vector<4x1xf32>
      %66 = arith.mulf %65, %57 : vector<4x1xf32>
      %67 = arith.mulf %48, %48 : vector<4x1xf32>
      %68 = arith.subf %66, %67 : vector<4x1xf32>
      %cst_48 = arith.constant 3.840000e+02 : f32
      %69 = vector.broadcast %cst_48 : f32 to vector<4x1xf32>
      %70 = arith.mulf %69, %60 : vector<4x1xf32>
      %71 = arith.mulf %51, %51 : vector<4x1xf32>
      %72 = arith.subf %70, %71 : vector<4x1xf32>
      %73 = arith.mulf %68, %72 : vector<4x1xf32>
      %74 = math.rsqrt %73 : vector<4x1xf32>
      %75 = arith.mulf %64, %74 : vector<4x1xf32>
      %cst_49 = arith.constant 1.000000e+00 : f32
      %76 = vector.broadcast %cst_49 : f32 to vector<4x1xf32>
      %77 = arith.subf %76, %75 : vector<4x1xf32>
      %78 = vector.shape_cast %77 : vector<4x1xf32> to vector<4x1xf32>
      %79 = vector.broadcast %78 : vector<4x1xf32> to vector<4x128xf32>
      %c0_50 = arith.constant 0 : index
      %c0_51 = arith.constant 0 : index
      %80 = vector.load %arg4[%c0_50, %c0_51] : memref<4x128xf32, #tpu.memory_space<vmem>>, vector<4x128xf32>
      tpu.vector_store %arg4[%c0_50, %c0_51], %79 {strides = array<i32>} : memref<4x128xf32, #tpu.memory_space<vmem>>, vector<4x128xf32>,
    } else {
    }
    return
  }
  func.func @transform_0(%arg0: i32, %arg1: i32) -> (i32, i32) {
    %c0_i32 = arith.constant 0 : i32
    return %arg0, %arg1 : i32, i32
  }
  func.func @transform_1(%arg0: i32, %arg1: i32) -> (i32, i32) {
    %c0_i32 = arith.constant 0 : i32
    return %arg0, %arg1 : i32, i32
  }
  func.func @transform_2(%arg0: i32, %arg1: i32) -> (i32, i32) {
    %c0_i32 = arith.constant 0 : i32
    %c0_i32_0 = arith.constant 0 : i32
    return %arg0, %c0_i32 : i32, i32
  }
}

</mosaic_0001>

<bundles_post_ra>
// kernel: negpea_loss.1
= control target key start
LH: loop header
LB: loop body
LE: loop exit
PB: predicated region body
PF: predicated region fallthrough
CT: control target
= control target key end

     0   :  { %7 = vsyncpa [#allocation8], 0  ;;  %s226_s0 = inlined_call_operand.hbm [shape: f32[4,384], index: 0, kind: input, shape index: {}]   ;;  %s227_s1 = inlined_call_operand.hbm [shape: f32[4,384], index: 1, kind: input, shape index: {}]   ;;  %s228_s2 = inlined_call_operand.vmem [shape: f32[4,128], index: 2, kind: output, shape index: {}]  }
   0x1   :  { %8 = vsyncpa [#allocation10], 0  ;;  %s181_s9 = smov [#allocation7]   ;;  %s182_s11 = smov [#allocation9]  }
   0x2   :  { %s15_s10 = sshll.u32 %s181_s9, 4  ;;  %s25_s12 = sshll.u32 %s182_s11, 4  ;;  %s16_s10 = int_to_ptr.vmem [resolvable:$true] %s15_s10  ;;  %s26_s12 = int_to_ptr.vmem [resolvable:$true] %s25_s12 }
   0x3   :  { %s133_s15 = scalar_lea.hbm %s226_s0, 192 }
   0x4   :  { %p134_p0 = scmp.ne.s32.totalorder %s226_s0, %s133_s15  ;;  %p137_p1 = scmp.lt.u32.totalorder %s133_s15, %s226_s0 }
   0x6   :  { %p139_p2 = pnand %p137_p1, %p134_p0 }
   0x8   :  { %142 = shalt.err (!%p139_p2)
}
   0x9   :  { %s143_s20 = scalar_lea.vmem %s16_s10, 192  ;;  %p148_p4 = scmp.lt.s32.totalorder %s16_s10, %s16_s10 }
   0xa   :  { %p144_p3 = scmp.ne.s32.totalorder %s16_s10, %s143_s20  ;;  %p149_p5 = scmp.lt.s32.totalorder %s143_s20, %s143_s20 }
   0xc   :  { %p150_p6 = por %p149_p5, %p148_p4 }
   0xe   :  { %p151_p7 = pnand %p150_p6, %p144_p3 }
  0x10   :  { %154 = shalt.err (!%p151_p7)
}
  0x11   :  { %18 = dma.hbm_to_vmem [thread:$0]  %s226_s0, 192, %s16_s10, [#allocation8]  }
  0x12   :  { %s155_s25 = scalar_lea.hbm %s227_s1, 192 }
  0x13   :  { %p156_p8 = scmp.ne.s32.totalorder %s227_s1, %s155_s25  ;;  %p159_p9 = scmp.lt.u32.totalorder %s155_s25, %s227_s1 }
  0x15   :  { %p161_p10 = pnand %p159_p9, %p156_p8 }
  0x17   :  { %164 = shalt.err (!%p161_p10)
}
  0x18   :  { %s165_s30 = scalar_lea.vmem %s26_s12, 192  ;;  %p170_p12 = scmp.lt.s32.totalorder %s26_s12, %s26_s12 }
  0x19   :  { %p166_p11 = scmp.ne.s32.totalorder %s26_s12, %s165_s30  ;;  %p171_p13 = scmp.lt.s32.totalorder %s165_s30, %s165_s30 }
  0x1b   :  { %p172_p0 = por %p171_p13, %p170_p12 }
  0x1d   :  { %p173_p1 = pnand %p172_p0, %p166_p11 }
  0x1f   :  { %176 = shalt.err (!%p173_p1)
}
  0x20   :  { %28 = dma.hbm_to_vmem [thread:$0]  %s227_s1, 192, %s26_s12, [#allocation10]  }
  0x21   :  { %177 = dma.done.wait [#allocation8], 192  }
  0x22   :  { %178 = vsyncadd [#allocation8], 4294967104 }
  0x23   :  { %179 = dma.done.wait [#allocation10], 192  }
  0x24   :  { %180 = vsyncadd [#allocation10], 4294967104  ;;  %v183_v0 = vmov 0.0   ;;  %v44_v1 = vld [vmem:[#allocation7] sm:$0xf]  ;;  %vm88_vm0 = vcmask 1043456  }
  0x25   :  { %39 = vst [vmem:[#allocation2] sm:$0xf] %v183_v0  ;;  %40 = vst [vmem:[#allocation3] sm:$0xf] %v183_v0  ;;  %v49_v2 = vld [vmem:[#allocation7 + $0x4] sm:$0xf]  ;;  %v47_v5 = vmul.f32 %v44_v1, %v44_v1 }
  0x26   :  { %41 = vst [vmem:[#allocation4] sm:$0xf] %v183_v0  ;;  %42 = vst [vmem:[#allocation5] sm:$0xf] %v183_v0  ;;  %v59_v3 = vld [vmem:[#allocation7 + $0x8] sm:$0xf]  ;;  %v54_v4 = vadd.f32 %v49_v2, %v44_v1  ;;  %v52_v6 = vmul.f32 %v49_v2, %v49_v2 }
  0x27   :  { %43 = vst [vmem:[#allocation6] sm:$0xf] %v183_v0  ;;  %v62_v7 = vmul.f32 %v59_v3, %v59_v3  ;;  %v45_v8 = vld [vmem:[#allocation9] sm:$0xf]  ;;  %v50_v10 = vld [vmem:[#allocation9 + $0x4] sm:$0xf] }
  0x28   :  { %v60_v11 = vld [vmem:[#allocation9 + $0x8] sm:$0xf]  ;;  %v48_v12 = vmul.f32 %v45_v8, %v45_v8  ;;  %v46_v13 = vmul.f32 %v45_v8, %v44_v1  ;;  %v64_v14 = vadd.f32 %v59_v3, %v54_v4  ;;  %v57_v15 = vadd.f32 %v52_v6, %v47_v5 }
  0x29   :  { %v55_v16 = vadd.f32 %v50_v10, %v45_v8  ;;  %v53_v17 = vmul.f32 %v50_v10, %v50_v10  ;;  %v63_v20 = vmul.f32 %v60_v11, %v60_v11  ;;  %v51_v21 = vmul.f32 %v50_v10, %v49_v2 }
  0x2a   :  { %v61_v22 = vmul.f32 %v60_v11, %v59_v3  ;;  %v67_v24 = vadd.f32 %v62_v7, %v57_v15 }
  0x2b   :  { %v65_v25 = vadd.f32 %v60_v11, %v55_v16  ;;  %v58_v26 = vadd.f32 %v53_v17, %v48_v12  ;;  %v56_v28 = vadd.f32 %v51_v21, %v46_v13 }
  0x2c   :  { %v69_v9 = vld [vmem:[#allocation2] sm:$0xf]  ;;  %v72_v19 = vld [vmem:[#allocation3] sm:$0xf] }
  0x2d   :  { %v78_v18 = vld [vmem:[#allocation5] sm:$0xf]  ;;  %v70_v23 = vadd.f32 %v69_v9, %v64_v14  ;;  %v73_v30 = vadd.f32 %v72_v19, %v65_v25  ;;  %v68_v31 = vadd.f32 %v63_v20, %v58_v26  ;;  %v75_v32 = vld [vmem:[#allocation4] sm:$0xf]  ;;  %v66_v33 = vadd.f32 %v61_v22, %v56_v28 }
  0x2e   :  { %v81_v27 = vld [vmem:[#allocation6] sm:$0xf]  ;;  %v79_v29 = vadd.f32 %v78_v18, %v67_v24 }
  0x2f   :  { %71 = vst [vmem:[#allocation2] sm:$0xf] %v70_v23  ;;  %74 = vst [vmem:[#allocation3] sm:$0xf] %v73_v30  ;;  %v82_v34 = vadd.f32 %v81_v27, %v68_v31  ;;  %v76_v35 = vadd.f32 %v75_v32, %v66_v33 }
  0x30   :  { %80 = vst [vmem:[#allocation5] sm:$0xf] %v79_v29 }
  0x31   :  { %83 = vst [vmem:[#allocation6] sm:$0xf] %v82_v34  ;;  %77 = vst [vmem:[#allocation4] sm:$0xf] %v76_v35 }
  0x36   :  { %v87_v36 = vld [vmem:[#allocation2] sm:$0xf]  ;;  %v92_v39 = vld [vmem:[#allocation3] sm:$0xf] }
  0x37   :  { %v89_v37 = vsel %vm88_vm0, %v87_v36, 0.0  ;;  %v100_v38 = vld [vmem:[#allocation5] sm:$0xf]  ;;  %v93_v41 = vsel %vm88_vm0, %v92_v39, 0.0 }
  0x38   :  { %90 = vadd.xlane.f32.xlu0 %v89_v37  ;;  %v101_v40 = vsel %vm88_vm0, %v100_v38, 0.0  ;;  %v104_v42 = vld [vmem:[#allocation6] sm:$0xf]  ;;  %v96_v44 = vld [vmem:[#allocation4] sm:$0xf] }
  0x39   :  { %102 = vadd.xlane.f32.xlu1 %v101_v40  ;;  %v105_v43 = vsel %vm88_vm0, %v104_v42, 0.0  ;;  %v97_v45 = vsel %vm88_vm0, %v96_v44, 0.0 }
  0x3c   :  { %94 = vadd.xlane.f32.xlu0 %v93_v41 }
  0x3d   :  { %106 = vadd.xlane.f32.xlu1 %v105_v43 }
  0x40   :  { %98 = vadd.xlane.f32.xlu0 %v97_v45 }
  0xc5   :  { %v91_v46 = vpop.xlane.xlu0 %90 }
  0xc6   :  { %v103_v47 = vpop.xlane.xlu1 %102  ;;  %v112_v49 = vmul.f32 %v91_v46, %v91_v46 }
  0xc7   :  { %v111_v50 = vmul.f32 384.0, %v103_v47 }
  0xc9   :  { %v95_v48 = vpop.xlane.xlu0 %94  ;;  %v113_v54 = vsub.f32 %v111_v50, %v112_v49 }
  0xca   :  { %v115_v51 = vmul.f32 %v95_v48, %v95_v48  ;;  %v107_v52 = vpop.xlane.xlu1 %106  ;;  %v109_v59 = vmul.f32 %v95_v48, %v91_v46 }
  0xcb   :  { %v114_v53 = vmul.f32 384.0, %v107_v52 }
  0xcd   :  { %v116_v55 = vsub.f32 %v114_v53, %v115_v51  ;;  %v99_v57 = vpop.xlane.xlu0 %98 }
  0xce   :  { %v108_v58 = vmul.f32 384.0, %v99_v57 }
  0xcf   :  { %v117_v56 = vmul.f32 %v116_v55, %v113_v54 }
  0xd0   :  { %v110_v60 = vsub.f32 %v108_v58, %v109_v59 }
  0xd1   :  { %131 = vrsqrt.f32 %v117_v56 }
  0xdb   :  { %v132_v61 = vpop.eup %131 }
  0xdc   :  { %v119_v62 = vmul.f32 %v132_v61, %v110_v60 }
  0xde   :  { %v120_v63 = vsub.f32 1.0, %v119_v62 }
  0xe0   :  { %121 = vst [vmem:[%s228_s2] sm:$0xf] %v120_v63 }
  0xe1   :  { %126 = vsyncpa [#allocation8], 1 }
  0xe2   :  { %127 = vsyncpa [#allocation10], 1 }

</bundles_post_ra>
